<compile_context>
chip_gen: v5e
topology: v5e:2x2
jax: 0.10.0
libtpu: 0.0.40
codegen_flags: <defaults>
</compile_context>

<pallas_src>
import functools
import math

import jax
import jax.numpy as jnp
from jax.experimental import pallas as pl
from jax.experimental.pallas import tpu as pltpu


def _round_up(x, m):
    return (x + m - 1) // m * m


def _pack_layout(h1, h2):
    """Layout of the single packed (R, C) f32 parameter slab.

    Two row blocks; narrow column vectors live in spare columns (tight pack):
      rows [0, h1):        cols 0:8       -> W1' (centering folded, K widened to 8)
                           col  8         -> b1
      rows [rB, rB+h2):    cols 0:h1      -> W2x
                           cols h1:h1+3   -> W2a
                           col  h1+3      -> b2
                           col  h1+4      -> w3 (fc3 weight as a column)
                           col  h1+5      -> b3 (row rB only)
    C is padded to a multiple of 128 so every row is a full lane tile.
    """
    rA = 0
    rB = _round_up(h1, 8)
    R = rB + _round_up(h2, 8)
    C = _round_up(max(h1 + 6, 9), 128)
    cols = dict(w2a=h1, b2=h1 + 3, w3=h1 + 4, b3=h1 + 5)
    return rA, rB, R, C, cols


def _make_q_kernel(h1, h2, rA, rB, cols):
    c_w2a, c_b2, c_w3, c_b3 = cols["w2a"], cols["b2"], cols["w3"], cols["b3"]

    def kernel(saT_ref, p_ref, o_ref):
        # Static slices into the packed parameter slab.
        w1 = p_ref[rA:rA + h1, 0:8]                 # (h1, 8); cols 5:8 are zero
        b1 = p_ref[rA:rA + h1, 8:9]                 # (h1, 1)
        w2x = p_ref[rB:rB + h2, 0:h1]               # (h2, h1)
        w2a = p_ref[rB:rB + h2, c_w2a:c_w2a + 3]    # (h2, 3)
        b2 = p_ref[rB:rB + h2, c_b2:c_b2 + 1]       # (h2, 1)
        w3 = p_ref[rB:rB + h2, c_w3:c_w3 + 1]       # (h2, 1)
        b3 = p_ref[rB:rB + 1, c_b3:c_b3 + 1]        # (1, 1)

        sa = saT_ref[...]                           # (8, TB); rows 0:5 s, 5:8 a

        # fc1 + relu over the full K=8 input tile (action columns of W1' are 0).
        # Activations are (hidden, TB): batch rides the lane axis.
        x = jnp.dot(w1, sa, preferred_element_type=jnp.float32) + b1
        x = jnp.maximum(x, 0.0)

        # fc2(cat([x, a], dim=1)) == W2x @ x + W2a @ aT + b2
        x = (jnp.dot(w2x, x, preferred_element_type=jnp.float32)
             + jnp.dot(w2a, sa[5:8, :], preferred_element_type=jnp.float32)
             + b2)
        x = jnp.maximum(x, 0.0)

        # fc3 (out=1): VPU multiply + sublane reduce -> lane-dense (1, TB) row.
        o_ref[...] = jnp.sum(x * w3, axis=0, keepdims=True) + b3

    return kernel


@functools.partial(jax.jit, static_argnames=("dim_hidden1", "dim_hidden2", "tb"))
def q_forward(s, a, packed_params, *, dim_hidden1, dim_hidden2, tb=4096):
    """s: (B, 5), a: (B, 3), packed_params from pack_q_params -> q: (B, 1)."""
    B = s.shape[0]
    h1, h2 = dim_hidden1, dim_hidden2
    rA, rB, R, C, cols = _pack_layout(h1, h2)
    assert packed_params.shape == (R, C), packed_params.shape

    # Lane-aligned batch tile: force TB % 128 == 0 regardless of caller's tb.
    tb = _round_up(max(int(tb), 128), 128)
    B_pad128 = _round_up(B, 128)
    TB = min(tb, B_pad128)
    # v7x has 2 TensorCores: if the whole batch would be one grid step and is
    # big enough to split, halve the tile so there are >= 2 "parallel" steps.
    if B_pad128 >= 256 and TB >= B_pad128:
        TB = _round_up((B_pad128 + 1) // 2, 128)
    B_pad = _round_up(B_pad128, TB)
    grid = (B_pad // TB,)

    # Single fused concat -> transpose -> pad producing one (8, B_pad)
    # feature-major slab (rows 0:5 = s, rows 5:8 = a), batch on the lane axis.
    saT = jnp.pad(
        jnp.concatenate([s, a], axis=1).astype(jnp.float32).T,
        ((0, 0), (0, B_pad - B)))

    param_bytes = R * C * 4
    param_spec = pl.BlockSpec((R, C), lambda i: (0, 0))  # resident across grid
    if param_bytes >= (4 << 20):
        # Large-H case: constant index_map -> block is never refetched; single
        # buffer it so the multi-MiB constant isn't double-buffered in VMEM
        # (matters on v7x's 64 MiB VMEM / 32 MiB default scope).
        param_spec = pl.BlockSpec((R, C), lambda i: (0, 0),
                                  pipeline_mode=pl.Buffered(1))

    # Scoped-VMEM headroom (v5e defaults to only 16 MiB scoped).
    needed = 2 * param_bytes + 2 * 4 * (8 * TB) + 2 * 4 * TB
    vmem_limit = int(min(max(32 << 20, 2 * needed), 64 << 20))

    flops = 2 * B_pad * (8 * h1 + h1 * h2 + 3 * h2 + h2)
    bytes_accessed = 4 * (B_pad * (8 + 1) + R * C)

    q_row = pl.pallas_call(
        _make_q_kernel(h1, h2, rA, rB, cols),
        out_shape=jax.ShapeDtypeStruct((1, B_pad), jnp.float32),
        grid=grid,
        in_specs=[
            pl.BlockSpec((8, TB), lambda i: (0, i)),
            param_spec,
        ],
        out_specs=pl.BlockSpec((1, TB), lambda i: (0, i)),
        compiler_params=pltpu.CompilerParams(
            dimension_semantics=("parallel",),
            vmem_limit_bytes=vmem_limit),
        cost_estimate=pl.CostEstimate(flops=flops, transcendentals=0,
                                      bytes_accessed=bytes_accessed),
    )(saT, packed_params)

    return q_row[0, :B].reshape(B, 1)


def init_q_params(key, dim_hidden1, dim_hidden2):
    """Deterministic init mirroring the PyTorch module (natural (out, in) layout).

    fc1 / fc2 weights use the paper's fanin_: uniform bound 2/sqrt(size[0]),
    where size[0] == out_features (quirk of the reference code).
    fc3 weight: uniform(-0.003, 0.003).
    Biases keep nn.Linear's default uniform(-1/sqrt(in_features), +).
    """
    h1, h2 = dim_hidden1, dim_hidden2
    ks = jax.random.split(key, 6)

    def unif(k, shape, bound):
        return jax.random.uniform(k, shape, jnp.float32, -bound, bound)

    w1 = unif(ks[0], (h1, 5), 2.0 / math.sqrt(h1))
    b1 = unif(ks[1], (h1,), 1.0 / math.sqrt(5.0))
    w2 = unif(ks[2], (h2, h1 + 3), 2.0 / math.sqrt(h2))
    b2 = unif(ks[3], (h2,), 1.0 / math.sqrt(h1 + 3.0))
    w3 = unif(ks[4], (1, h2), 0.003)
    b3 = unif(ks[5], (1,), 1.0 / math.sqrt(h2))
    return (w1, b1, w2, b2, w3, b3)


def pack_q_params(params, dim_hidden1, dim_hidden2):
    """Pack all 7 parameter tensors into one tight (R, C) f32 slab (single DMA).

    The feature-mean centering of `s` is folded into the fc1 weight here:
      W1' = [W1 @ (I5 - (1/5)*ones(5,5)) | zeros(h1, 3)]      # widened to K=8
    so the kernel is a pure matmul/relu chain over the merged (8, B) input.
    Done once, outside the forward.
    """
    w1, b1, w2, b2, w3, b3 = params
    h1, h2 = dim_hidden1, dim_hidden2
    rA, rB, R, C, cols = _pack_layout(h1, h2)

    center = jnp.eye(5, dtype=jnp.float32) - jnp.full((5, 5), 0.2, jnp.float32)
    w1c = w1.astype(jnp.float32) @ center
    w1p = jnp.concatenate([w1c, jnp.zeros((h1, 3), jnp.float32)], axis=1)

    p = jnp.zeros((R, C), jnp.float32)
    p = p.at[rA:rA + h1, 0:8].set(w1p)
    p = p.at[rA:rA + h1, 8:9].set(b1.reshape(h1, 1).astype(jnp.float32))
    p = p.at[rB:rB + h2, 0:h1].set(w2[:, :h1].astype(jnp.float32))
    p = p.at[rB:rB + h2, cols["w2a"]:cols["w2a"] + 3].set(
        w2[:, h1:].astype(jnp.float32))
    p = p.at[rB:rB + h2, cols["b2"]:cols["b2"] + 1].set(
        b2.reshape(h2, 1).astype(jnp.float32))
    p = p.at[rB:rB + h2, cols["w3"]:cols["w3"] + 1].set(
        w3.reshape(h2, 1).astype(jnp.float32))
    p = p.at[rB, cols["b3"]].set(b3.reshape(()).astype(jnp.float32))
    return p


def q_reference(s, a, params):
    """Pure-JAX mirror of the PyTorch forward (for verification)."""
    w1, b1, w2, b2, w3, b3 = params
    s = s - jnp.mean(s, axis=1, keepdims=True)
    x = jnp.maximum(s @ w1.T + b1, 0.0)
    x = jnp.maximum(jnp.concatenate([x, a], axis=1) @ w2.T + b2, 0.0)
    return x @ w3.T + b3


if __name__ == "__main__":
    key = jax.random.PRNGKey(0)
    k_s, k_a, k_p = jax.random.split(key, 3)

    B = 8
    DIM_HIDDEN1 = 32
    DIM_HIDDEN2 = 32

    s = jax.random.normal(k_s, (B, 5), jnp.float32)
    a = jax.random.normal(k_a, (B, 3), jnp.float32)
    params = init_q_params(k_p, DIM_HIDDEN1, DIM_HIDDEN2)
    packed = pack_q_params(params, DIM_HIDDEN1, DIM_HIDDEN2)

    out = q_forward(s, a, packed, dim_hidden1=DIM_HIDDEN1, dim_hidden2=DIM_HIDDEN2)
    out = jax.block_until_ready(out)

    ref = q_reference(s, a, params)
    assert out.shape == (B, 1), out.shape
    assert jnp.allclose(out, ref, atol=1e-5, rtol=1e-5), (out, ref)

    print("KERNEL_OK")
</pallas_src>

<mosaic_0001>
module attributes {stable_mosaic.version = 11 : i64} {
  func.func @kernel(%arg0: i32, %arg1: memref<8x128xf32, #tpu.memory_space<vmem>>, %arg2: memref<64x128xf32, #tpu.memory_space<vmem>>, %arg3: memref<1x128xf32, #tpu.memory_space<vmem>>) attributes {dimension_semantics = [#tpu.dimension_semantics<parallel>], iteration_bounds = array<i64: 1>, scalar_prefetch = 0 : i64, scratch_operands = 0 : i64, tpu.core_type = #tpu.core_type<tc>, window_params = [{transform_indices = @transform_0, window_bounds = array<i64: 8, 128>}, {pipeline_mode = #tpu.pipeline_mode<synchronous>, transform_indices = @transform_1, window_bounds = array<i64: 64, 128>}, {transform_indices = @transform_2, window_bounds = array<i64: 1, 128>}]} {
    %c0 = arith.constant 0 : index
    %c0_0 = arith.constant 0 : index
    %0 = vector.load %arg2[%c0, %c0_0] : memref<64x128xf32, #tpu.memory_space<vmem>>, vector<32x8xf32>
    %c0_1 = arith.constant 0 : index
    %c8 = arith.constant 8 : index
    %1 = vector.load %arg2[%c0_1, %c8] : memref<64x128xf32, #tpu.memory_space<vmem>>, vector<32x1xf32>
    %c32 = arith.constant 32 : index
    %c0_2 = arith.constant 0 : index
    %2 = vector.load %arg2[%c32, %c0_2] : memref<64x128xf32, #tpu.memory_space<vmem>>, vector<32x32xf32>
    %c32_3 = arith.constant 32 : index
    %c32_4 = arith.constant 32 : index
    %3 = vector.load %arg2[%c32_3, %c32_4] : memref<64x128xf32, #tpu.memory_space<vmem>>, vector<32x3xf32>
    %c32_5 = arith.constant 32 : index
    %c35 = arith.constant 35 : index
    %4 = vector.load %arg2[%c32_5, %c35] : memref<64x128xf32, #tpu.memory_space<vmem>>, vector<32x1xf32>
    %c32_6 = arith.constant 32 : index
    %c36 = arith.constant 36 : index
    %5 = vector.load %arg2[%c32_6, %c36] : memref<64x128xf32, #tpu.memory_space<vmem>>, vector<32x1xf32>
    %c32_7 = arith.constant 32 : index
    %c37 = arith.constant 37 : index
    %6 = vector.load %arg2[%c32_7, %c37] : memref<64x128xf32, #tpu.memory_space<vmem>>, vector<1x1xf32>
    %c0_8 = arith.constant 0 : index
    %c0_9 = arith.constant 0 : index
    %7 = vector.load %arg1[%c0_8, %c0_9] : memref<8x128xf32, #tpu.memory_space<vmem>>, vector<8x128xf32>
    %cst = arith.constant dense<0.000000e+00> : vector<32x128xf32>
    %8 = tpu.matmul %0, %7, %cst {dimension_numbers = #tpu.dot_dimension_numbers<[1], [0], [0], [1], [0, 0, 1, 1], [], []>} : vector<32x8xf32>, vector<8x128xf32>, vector<32x128xf32> -> vector<32x128xf32>
    %9 = vector.broadcast %1 : vector<32x1xf32> to vector<32x128xf32>
    %10 = arith.addf %8, %9 : vector<32x128xf32>
    %cst_10 = arith.constant 0.000000e+00 : f32
    %11 = vector.broadcast %cst_10 : f32 to vector<32x128xf32>
    %12 = arith.maximumf %10, %11 : vector<32x128xf32>
    %cst_11 = arith.constant dense<0.000000e+00> : vector<32x128xf32>
    %13 = tpu.matmul %2, %12, %cst_11 {dimension_numbers = #tpu.dot_dimension_numbers<[1], [0], [0], [1], [0, 0, 1, 1], [], []>} : vector<32x32xf32>, vector<32x128xf32>, vector<32x128xf32> -> vector<32x128xf32>
    %14 = vector.extract_strided_slice %7 {offsets = [5, 0], sizes = [3, 128], strides = [1, 1]} : vector<8x128xf32> to vector<3x128xf32>
    %cst_12 = arith.constant dense<0.000000e+00> : vector<32x128xf32>
    %15 = tpu.matmul %3, %14, %cst_12 {dimension_numbers = #tpu.dot_dimension_numbers<[1], [0], [0], [1], [0, 0, 1, 1], [], []>} : vector<32x3xf32>, vector<3x128xf32>, vector<32x128xf32> -> vector<32x128xf32>
    %16 = arith.addf %13, %15 : vector<32x128xf32>
    %17 = vector.broadcast %4 : vector<32x1xf32> to vector<32x128xf32>
    %18 = arith.addf %16, %17 : vector<32x128xf32>
    %cst_13 = arith.constant 0.000000e+00 : f32
    %19 = vector.broadcast %cst_13 : f32 to vector<32x128xf32>
    %20 = arith.maximumf %18, %19 : vector<32x128xf32>
    %21 = vector.broadcast %5 : vector<32x1xf32> to vector<32x128xf32>
    %22 = arith.mulf %20, %21 : vector<32x128xf32>
    %cst_14 = arith.constant dense<0.000000e+00> : vector<128xf32>
    %23 = vector.multi_reduction <add>, %22, %cst_14 [0] : vector<32x128xf32> to vector<128xf32>
    %24 = vector.shape_cast %23 : vector<128xf32> to vector<1x128xf32>
    %25 = vector.broadcast %6 : vector<1x1xf32> to vector<1x128xf32>
    %26 = arith.addf %24, %25 : vector<1x128xf32>
    %c0_15 = arith.constant 0 : index
    %c0_16 = arith.constant 0 : index
    %27 = vector.load %arg3[%c0_15, %c0_16] : memref<1x128xf32, #tpu.memory_space<vmem>>, vector<1x128xf32>
    tpu.vector_store %arg3[%c0_15, %c0_16], %26 {strides = array<i32>} : memref<1x128xf32, #tpu.memory_space<vmem>>, vector<1x128xf32>,
    return
  }
  func.func @transform_0(%arg0: i32) -> (i32, i32) {
    %c0_i32 = arith.constant 0 : i32
    %c0_i32_0 = arith.constant 0 : i32
    return %c0_i32, %arg0 : i32, i32
  }
  func.func @transform_1(%arg0: i32) -> (i32, i32) {
    %c0_i32 = arith.constant 0 : i32
    %c0_i32_0 = arith.constant 0 : i32
    %c0_i32_1 = arith.constant 0 : i32
    return %c0_i32, %c0_i32_0 : i32, i32
  }
  func.func @transform_2(%arg0: i32) -> (i32, i32) {
    %c0_i32 = arith.constant 0 : i32
    %c0_i32_0 = arith.constant 0 : i32
    return %c0_i32, %arg0 : i32, i32
  }
}

</mosaic_0001>

<bundles_post_ra>
// kernel: q_forward.1
= control target key start
LH: loop header
LB: loop body
LE: loop exit
PB: predicated region body
PF: predicated region fallthrough
CT: control target
= control target key end

     0   :  { %7 = vsyncpa [#allocation3], 0  ;;  %s318_s12 = smov [#allocation2]   ;;  %s319_s14 = smov 128   ;;  %s382_s0 = inlined_call_operand.vmem [shape: f32[8,128], index: 0, kind: input, shape index: {}]   ;;  %s383_s1 = inlined_call_operand.hbm [shape: f32[64,128], index: 1, kind: input, shape index: {}]   ;;  %s384_s2 = inlined_call_operand.vmem [shape: f32[1,128], index: 2, kind: output, shape index: {}]  }
   0x1   :  { %s14_s11 = sshll.u32 %s383_s1, 4  ;;  %s16_s13 = sshll.u32 %s318_s12, 4  ;;  %s15_s11 = int_to_ptr.hbm [resolvable:$true] %s14_s11  ;;  %s17_s13 = int_to_ptr.vmem [resolvable:$true] %s16_s13 }
   0x2   :  { %s320_s15 = smov 8  }
   0x3   :  { %22 = dma.hbm_to_vmem [thread:$0]  %s15_s11, 1024, %s17_s13, [#allocation3], %s319_s14, %s319_s14, %s320_s15  }
   0x4   :  { %316 = dma.done.wait [#allocation3], 1024  }
   0x5   :  { %317 = vsyncadd [#allocation3], 4294966272  ;;  %v321_v0 = vmov 8   ;;  %vm57_vm0 = vcmask 64512   ;;  %v36_v1 = vld [vmem:[%s382_s0] sm:$0xff]  ;;  %v28_v3 = vld [vmem:[#allocation2 + $0x8] sm:$0xff] }
   0x6   :  { %283 = vset.pattern.permute.xlu1 %v321_v0  ;;  %282 = vset.pattern.permute.xlu0 %v321_v0  ;;  %v27_v2 = vld [vmem:[#allocation2] sm:$0xff]  ;;  %v30_v4 = vld [vmem:[#allocation2 + $0x18] sm:$0xff]  ;;  %s322_s1 = smov 96   ;;  %v351_v6 = vld [vmem:[#allocation2 + $0x28] sm:$0xff]  ;;  %v112_v11 = vrot.slane %v36_v1, 5  ;;  %vm122_vm1 = vcmask 1042432  }
   0x7   :  { %81 = vmatpush.msra.mxu0 %v36_v1  ;;  %44 = vperm.xlu1 %283, %v28_v3   ;;  %v348_v5 = vld [vmem:[#allocation2 + $0x20] sm:$0xff]  ;;  %v29_v7 = vld [vmem:[#allocation2 + $0x10] sm:$0xff]  ;;  %v355_v8 = vld [vmem:[#allocation2 + $0x38] sm:$0xff]  ;;  %vm113_vm2 = vcmask 23552   ;;  %v323_v18 = vmov 35   ;;  %v324_v22 = vmov 36  }
   0x8   :  { %257 = vmatmul.msk.f32.vlgmr.msra.gmra.mxu0 %vm57_vm0, %v27_v2  ;;  %54 = vperm.xlu0 %282, %v30_v4   ;;  %v357_v9 = vld [vmem:[#allocation2 + $0x30] sm:$0xff]  ;;  %vm154_vm3 = vcmask 261120   ;;  %v325_v33 = vmov 37   ;;  %v35_v34 = vld [vmem:[#allocation2 + $0x20] sm:$0x1] }
   0x9   :  { %103 = vrot.lane.b32.xlu2 %v348_v5, %s322_s1  ;;  %261 = vmatpush.msk.msra.mxu1 %vm122_vm1, %v112_v11 }
   0xa   :  { %284 = vset.pattern.permute.xlu2 %v323_v18 }
   0xf   :  { %39 = vperm.xlu1 %283, %v27_v2  }
  0x10   :  { %258 = vmatmul.msk.f32.gmra.mxu0 %vm57_vm0, %v28_v3  ;;  %49 = vperm.xlu0 %282, %v29_v7  }
  0x11   :  { %105 = vrot.lane.b32.xlu2 %v351_v6, %s322_s1 }
  0x17   :  { %109 = vrot.lane.b32.xlu1 %v355_v8, %s322_s1 }
  0x18   :  { %259 = vmatmul.msk.f32.gmra.mxu0 %vm57_vm0, %v29_v7  ;;  %107 = vrot.lane.b32.xlu0 %v357_v9, %s322_s1 }
  0x19   :  { %286 = vset.pattern.permute.xlu1 %v323_v18  ;;  %285 = vset.pattern.permute.xlu0 %v323_v18 }
  0x1a   :  { %193 = vperm.xlu2 %284, %v348_v5  }
  0x1f   :  { %201 = vperm.xlu1 %286, %v357_v9  }
  0x20   :  { %260 = vmatmul.msk.f32.gmra.mxu0 %vm57_vm0, %v30_v4  ;;  %197 = vperm.xlu0 %285, %v351_v6  }
  0x22   :  { %205 = vperm.xlu2 %284, %v355_v8  }
  0x27   :  { %287 = vset.pattern.permute.xlu1 %v324_v22 }
  0x28   :  { %289 = vset.pattern.permute.xlu0 %v324_v22  ;;  %217 = vperm.xlu1 %287, %v348_v5  }
  0x29   :  { %225 = vperm.xlu0 %289, %v357_v9  }
  0x2a   :  { %288 = vset.pattern.permute.xlu2 %v324_v22 }
  0x2b   :  { %221 = vperm.xlu2 %288, %v351_v6  }
  0x30   :  { %229 = vperm.xlu1 %287, %v355_v8  }
  0x31   :  { %291 = vset.pattern.permute.xlu0 %v325_v33 }
  0x33   :  { %290 = vset.pattern.permute.xlu2 %v325_v33 }
  0x34   :  { %247 = vperm.xlu2 %290, %v35_v34  }
  0x63   :  { %v104_v12 = vpop.permute.xlu2 %103 }
  0x64   :  { %262 = vmatmul.msk.f32.vlgmr.msra.gmra.mxu1 %vm113_vm2, %v104_v12 }
  0x6b   :  { %v106_v16 = vpop.permute.xlu2 %105 }
  0x6c   :  { %263 = vmatmul.msk.f32.gmra.mxu1 %vm113_vm2, %v106_v16 }
  0x74   :  { %v194_v36 = vpop.permute.xlu2 %193 }
  0x79   :  { %v45_v14 = vpop.permute.xlu1 %44 }
  0x7a   :  { %v55_v10 = vpop.permute.xlu0 %54 }
  0x7c   :  { %v206_v41 = vpop.permute.xlu2 %205 }
  0x81   :  { %v40_v19 = vpop.permute.xlu1 %39 }
  0x82   :  { %v50_v15 = vpop.permute.xlu0 %49 }
  0x85   :  { %v83_v13 = vpop.f32.mrf.mxu0  ;;  %v222_v54 = vpop.permute.xlu2 %221 }
  0x86   :  { %v84_v29 = vadd.f32 %v83_v13, %v40_v19 }
  0x88   :  { %v95_v32 = vmax.f32 %v84_v29, 0.0 }
  0x89   :  { %v110_v23 = vpop.permute.xlu1 %109 }
  0x8a   :  { %v108_v20 = vpop.permute.xlu0 %107 }
  0x8b   :  { %264 = vmatmul.msk.f32.gmra.mxu1 %vm113_vm2, %v108_v20 }
  0x8d   :  { %v86_v17 = vpop.f32.mrf.mxu0 }
  0x8e   :  { %v87_v27 = vadd.f32 %v86_v17, %v45_v14  ;;  %v248_v11 = vpop.permute.xlu2 %247 }
  0x90   :  { %v96_v31 = vmax.f32 %v87_v27, 0.0 }
  0x91   :  { %v202_v39 = vpop.permute.xlu1 %201 }
  0x92   :  { %v198_v45 = vpop.permute.xlu0 %197 }
  0x93   :  { %265 = vmatmul.msk.f32.gmra.mxu1 %vm113_vm2, %v110_v23 }
  0x95   :  { %v89_v21 = vpop.f32.mrf.mxu0 }
  0x96   :  { %v90_v25 = vadd.f32 %v89_v21, %v50_v15 }
  0x98   :  { %v97_v30 = vmax.f32 %v90_v25, 0.0 }
  0x9a   :  { %v218_v51 = vpop.permute.xlu1 %217 }
  0x9b   :  { %v226_v57 = vpop.permute.xlu0 %225 }
  0x9d   :  { %v92_v24 = vpop.f32.mrf.mxu0 }
  0x9e   :  { %v93_v26 = vadd.f32 %v92_v24, %v55_v10 }
  0xa0   :  { %v98_v28 = vmax.f32 %v93_v26, 0.0 }
  0xa2   :  { %175 = vmatpush.msra.mxu2 %v98_v28  ;;  %270 = vmatpush.msra.mxu3 %v98_v28  ;;  %v230_v2 = vpop.permute.xlu1 %229 }
  0xa4   :  { %176 = vmatpush.msra.mxu2 %v97_v30  ;;  %271 = vmatpush.msra.mxu3 %v97_v30 }
  0xa6   :  { %177 = vmatpush.msra.mxu2 %v96_v31  ;;  %272 = vmatpush.msra.mxu3 %v96_v31 }
  0xa8   :  { %178 = vmatpush.msra.mxu2 %v95_v32  ;;  %273 = vmatpush.msra.mxu3 %v95_v32 }
  0xa9   :  { %266 = vmatmul.msk.f32.vlgmr.msra.gmra.mxu2 %vm154_vm3, %v348_v5  ;;  %267 = vmatmul.msk.f32.vlgmr.msra.gmra.mxu3 %vm154_vm3, %v351_v6 }
  0xb1   :  { %268 = vmatmul.msk.f32.gmra.mxu3 %vm154_vm3, %v357_v9 }
  0xb9   :  { %269 = vmatmul.msk.f32.gmra.mxu3 %vm154_vm3, %v355_v8 }
  0xe1   :  { %v142_v35 = vpop.f32.mrf.mxu1 }
  0xe9   :  { %v145_v37 = vpop.f32.mrf.mxu1 }
 0x108   :  { %v148_v42 = vpop.f32.mrf.mxu1 }
 0x110   :  { %v151_v55 = vpop.f32.mrf.mxu1 }
 0x12c   :  { %v183_v38 = vpop.f32.mrf.mxu3  ;;  %v180_v40 = vpop.f32.mrf.mxu2 }
 0x12d   :  { %v181_v43 = vadd.f32 %v180_v40, %v142_v35  ;;  %v184_v44 = vadd.f32 %v183_v38, %v145_v37 }
 0x12f   :  { %v208_v47 = vadd.f32 %v194_v36, %v181_v43  ;;  %v209_v48 = vadd.f32 %v198_v45, %v184_v44 }
 0x131   :  { %v213_v52 = vmax.f32 %v209_v48, 0.0  ;;  %v212_v53 = vmax.f32 %v208_v47, 0.0 }
 0x133   :  { %v233_v59 = vmul.f32 %v222_v54, %v213_v52  ;;  %v232_v60 = vmul.f32 %v218_v51, %v212_v53 }
 0x134   :  { %v186_v46 = vpop.f32.mrf.mxu3 }
 0x135   :  { %v187_v49 = vadd.f32 %v186_v46, %v148_v42  ;;  %v236_v0 = vadd.f32 %v233_v59, %v232_v60 }
 0x137   :  { %v210_v50 = vadd.f32 %v202_v39, %v187_v49 }
 0x139   :  { %v214_v56 = vmax.f32 %v210_v50, 0.0 }
 0x13b   :  { %v234_v62 = vmul.f32 %v226_v57, %v214_v56 }
 0x13c   :  { %v189_v58 = vpop.f32.mrf.mxu3 }
 0x13d   :  { %v190_v61 = vadd.f32 %v189_v58, %v151_v55  ;;  %v237_v3 = vadd.f32 %v236_v0, %v234_v62 }
 0x13f   :  { %v211_v63 = vadd.f32 %v206_v41, %v190_v61 }
 0x141   :  { %v215_v1 = vmax.f32 %v211_v63, 0.0 }
 0x143   :  { %v235_v4 = vmul.f32 %v230_v2, %v215_v1 }
 0x145   :  { %v238_v5 = vadd.f32 %v237_v3, %v235_v4 }
 0x147   :  { %v239_v6 = vrot.slane %v238_v5, 4 }
 0x149   :  { %v240_v7 = vadd.f32 %v239_v6, %v238_v5 }
 0x14b   :  { %v241_v8 = vrot.slane %v240_v7, 2 }
 0x14d   :  { %v242_v9 = vadd.f32 %v241_v8, %v240_v7 }
 0x14f   :  { %v243_v10 = vrot.slane %v242_v9, 1 }
 0x151   :  { %v244_v12 = vadd.f32 %v243_v10, %v242_v9 }
 0x153   :  { %v250_v13 = vadd.f32 %v248_v11, %v244_v12 }
 0x155   :  { %251 = vst [vmem:[%s384_s2] sm:$0x1] %v250_v13 }
 0x156   :  { %256 = vsyncpa [#allocation3], 1 }

</bundles_post_ra>
